<compile_context>
chip_gen: v6e
topology: v6e:2x2x1
jax: 0.10.0
libtpu: 0.0.40
codegen_flags: <defaults>
</compile_context>

<pallas_src>
import functools

import jax
import jax.numpy as jnp
from jax.experimental import pallas as pl
from jax.experimental.pallas import tpu as pltpu


def _round_up(n, m):
    return ((n + m - 1) // m) * m


def urbf_kernel(x_ref, wrbf_ref, sig2_ref, brbf_ref,
                w1_ref, b1_ref, w2_ref, b2_ref, o_ref):
    x = x_ref[...]                                                     # (TB, D) f32
    x2 = jnp.sum(x * x, axis=-1, keepdims=True)                        # (TB, 1)

    # -sigma^2 * ||x - c||^2  ==  x @ W_rbf  -  sigma^2 * ||x||^2  +  bias_rbf
    arg = (jnp.dot(x, wrbf_ref[...], preferred_element_type=jnp.float32)
           - x2 * sig2_ref[...]
           + brbf_ref[...])                                            # (TB, K)
    phi = jnp.exp(arg)                                                 # gaussian RBF features

    # Hidden Linear + ReLU
    h = jnp.dot(phi, w1_ref[...], preferred_element_type=jnp.float32) + b1_ref[...]
    h = jnp.maximum(h, 0.0)                                            # (TB, H)

    # Output Linear
    o_ref[...] = (jnp.dot(h, w2_ref[...], preferred_element_type=jnp.float32)
                  + b2_ref[...])                                       # (TB, O)


@functools.partial(jax.jit, static_argnames=("tile_b",))
def urbf_forward(x, centers, sigmas, w1, b1, w2, b2, *, tile_b=4096):
    B, D = x.shape
    K = centers.shape[0]
    H = w1.shape[1]
    O = w2.shape[1]

    # --- fold RBF constants (done once in the wrapper, reused by every tile) ---
    sig2 = (sigmas * sigmas).astype(jnp.float32)                       # (1, K)
    w_rbf = (2.0 * sig2.T * centers).T                                 # (D, K)
    bias_rbf = -(sig2 * jnp.sum(centers * centers, axis=-1)[None, :])  # (1, K)

    # --- batch tiling: tile must be a multiple of 8 sublanes; pad B up to it ---
    tb = min(tile_b, _round_up(B, 8))
    tb = _round_up(tb, 8)
    b_padded = _round_up(B, tb)
    if b_padded != B:
        x = jnp.pad(x, ((0, b_padded - B), (0, 0)))
    grid = (b_padded // tb,)

    const = lambda i: (0, 0)   # params resident in VMEM, not re-DMA'd per step

    out = pl.pallas_call(
        urbf_kernel,
        out_shape=jax.ShapeDtypeStruct((b_padded, O), jnp.float32),
        grid=grid,
        in_specs=[
            pl.BlockSpec((tb, D), lambda i: (i, 0)),   # x: batch-tiled, pipelined
            pl.BlockSpec((D, K), const),               # W_rbf
            pl.BlockSpec((1, K), const),               # sigma^2
            pl.BlockSpec((1, K), const),               # bias_rbf
            pl.BlockSpec((K, H), const),               # W1
            pl.BlockSpec((1, H), const),               # b1
            pl.BlockSpec((H, O), const),               # W2
            pl.BlockSpec((1, O), const),               # b2
        ],
        out_specs=pl.BlockSpec((tb, O), lambda i: (i, 0)),
        compiler_params=pltpu.CompilerParams(
            dimension_semantics=("parallel",),         # megacore sharding on v7x
        ),
    )(x, w_rbf, sig2, bias_rbf, w1, b1, w2, b2)

    if b_padded != B:
        out = out[:B]
    return out


def init_params(key, input_size, n_kernels, hidden, output_size):
    k_c, k_s, k_w1, k_b1, k_w2, k_b2 = jax.random.split(key, 6)
    centers = jax.random.normal(k_c, (n_kernels, input_size), jnp.float32)
    sigmas = jnp.abs(jax.random.normal(k_s, (1, n_kernels), jnp.float32)) + 0.5
    # PyTorch-style uniform(-1/sqrt(fan_in), 1/sqrt(fan_in)) Linear init.
    lim1 = 1.0 / jnp.sqrt(jnp.float32(n_kernels))
    w1 = jax.random.uniform(k_w1, (n_kernels, hidden), jnp.float32, -lim1, lim1)
    b1 = jax.random.uniform(k_b1, (1, hidden), jnp.float32, -lim1, lim1)
    lim2 = 1.0 / jnp.sqrt(jnp.float32(hidden))
    w2 = jax.random.uniform(k_w2, (hidden, output_size), jnp.float32, -lim2, lim2)
    b2 = jax.random.uniform(k_b2, (1, output_size), jnp.float32, -lim2, lim2)
    return centers, sigmas, w1, b1, w2, b2


def reference_forward(x, centers, sigmas, w1, b1, w2, b2):
    # Pure-JAX reference (direct distance form) for sanity checking.
    d2 = jnp.sum((x[:, None, :] - centers[None, :, :]) ** 2, axis=-1)
    phi = jnp.exp(-(d2 * (sigmas ** 2)))
    h = jnp.maximum(phi @ w1 + b1, 0.0)
    return h @ w2 + b2


if __name__ == "__main__":
    # Shapes consistent with the module:
    #   input_size=16, config.hidden_units=[32, 32], output_size=4, batch=8
    B, D, K, H, O = 8, 16, 32, 32, 4

    key = jax.random.PRNGKey(0)
    k_x, k_p, k_x2 = jax.random.split(key, 3)
    params = init_params(k_p, input_size=D, n_kernels=K, hidden=H, output_size=O)

    # Small single-tile case.
    x = jax.random.normal(k_x, (B, D), jnp.float32)
    y = urbf_forward(x, *params)
    jax.block_until_ready(y)
    y_ref = reference_forward(x, *params)
    assert y.shape == (B, O)
    assert jnp.allclose(y, y_ref, atol=1e-4, rtol=1e-4), "mismatch vs reference (B=8)"

    # Multi-tile case with a partial last tile (exercises grid + padding path).
    B2 = 200
    x2 = jax.random.normal(k_x2, (B2, D), jnp.float32)
    y2 = urbf_forward(x2, *params, tile_b=64)
    jax.block_until_ready(y2)
    y2_ref = reference_forward(x2, *params)
    assert y2.shape == (B2, O)
    assert jnp.allclose(y2, y2_ref, atol=1e-4, rtol=1e-4), "mismatch vs reference (B=200)"

    print("KERNEL_OK")
</pallas_src>

<mosaic_0001>
module attributes {stable_mosaic.version = 11 : i64} {
  func.func @urbf_kernel(%arg0: i32, %arg1: memref<8x16xf32, #tpu.memory_space<vmem>>, %arg2: memref<16x32xf32, #tpu.memory_space<vmem>>, %arg3: memref<1x32xf32, #tpu.memory_space<vmem>>, %arg4: memref<1x32xf32, #tpu.memory_space<vmem>>, %arg5: memref<32x32xf32, #tpu.memory_space<vmem>>, %arg6: memref<1x32xf32, #tpu.memory_space<vmem>>, %arg7: memref<32x4xf32, #tpu.memory_space<vmem>>, %arg8: memref<1x4xf32, #tpu.memory_space<vmem>>, %arg9: memref<8x4xf32, #tpu.memory_space<vmem>>) attributes {dimension_semantics = [#tpu.dimension_semantics<parallel>], iteration_bounds = array<i64: 1>, scalar_prefetch = 0 : i64, scratch_operands = 0 : i64, tpu.core_type = #tpu.core_type<tc>, window_params = [{transform_indices = @transform_0, window_bounds = array<i64: 8, 16>}, {pipeline_mode = #tpu.pipeline_mode<synchronous>, transform_indices = @transform_1, window_bounds = array<i64: 16, 32>}, {pipeline_mode = #tpu.pipeline_mode<synchronous>, transform_indices = @transform_2, window_bounds = array<i64: 1, 32>}, {pipeline_mode = #tpu.pipeline_mode<synchronous>, transform_indices = @transform_3, window_bounds = array<i64: 1, 32>}, {pipeline_mode = #tpu.pipeline_mode<synchronous>, transform_indices = @transform_4, window_bounds = array<i64: 32, 32>}, {pipeline_mode = #tpu.pipeline_mode<synchronous>, transform_indices = @transform_5, window_bounds = array<i64: 1, 32>}, {pipeline_mode = #tpu.pipeline_mode<synchronous>, transform_indices = @transform_6, window_bounds = array<i64: 32, 4>}, {pipeline_mode = #tpu.pipeline_mode<synchronous>, transform_indices = @transform_7, window_bounds = array<i64: 1, 4>}, {transform_indices = @transform_8, window_bounds = array<i64: 8, 4>}]} {
    %c0 = arith.constant 0 : index
    %c0_0 = arith.constant 0 : index
    %0 = vector.load %arg1[%c0, %c0_0] : memref<8x16xf32, #tpu.memory_space<vmem>>, vector<8x16xf32>
    %1 = arith.mulf %0, %0 : vector<8x16xf32>
    %cst = arith.constant dense<0.000000e+00> : vector<8xf32>
    %2 = vector.multi_reduction <add>, %1, %cst [1] : vector<8x16xf32> to vector<8xf32>
    %3 = vector.shape_cast %2 : vector<8xf32> to vector<8x1xf32>
    %c0_1 = arith.constant 0 : index
    %c0_2 = arith.constant 0 : index
    %4 = vector.load %arg2[%c0_1, %c0_2] : memref<16x32xf32, #tpu.memory_space<vmem>>, vector<16x32xf32>
    %cst_3 = arith.constant dense<0.000000e+00> : vector<8x32xf32>
    %5 = tpu.matmul %0, %4, %cst_3 {dimension_numbers = #tpu.dot_dimension_numbers<[1], [0], [0], [1], [0, 0, 1, 1], [], []>} : vector<8x16xf32>, vector<16x32xf32>, vector<8x32xf32> -> vector<8x32xf32>
    %c0_4 = arith.constant 0 : index
    %c0_5 = arith.constant 0 : index
    %6 = vector.load %arg3[%c0_4, %c0_5] : memref<1x32xf32, #tpu.memory_space<vmem>>, vector<1x32xf32>
    %7 = vector.broadcast %3 : vector<8x1xf32> to vector<8x32xf32>
    %8 = vector.broadcast %6 : vector<1x32xf32> to vector<8x32xf32>
    %9 = arith.mulf %7, %8 : vector<8x32xf32>
    %10 = arith.subf %5, %9 : vector<8x32xf32>
    %c0_6 = arith.constant 0 : index
    %c0_7 = arith.constant 0 : index
    %11 = vector.load %arg4[%c0_6, %c0_7] : memref<1x32xf32, #tpu.memory_space<vmem>>, vector<1x32xf32>
    %12 = vector.broadcast %11 : vector<1x32xf32> to vector<8x32xf32>
    %13 = arith.addf %10, %12 : vector<8x32xf32>
    %14 = math.exp %13 : vector<8x32xf32>
    %c0_8 = arith.constant 0 : index
    %c0_9 = arith.constant 0 : index
    %15 = vector.load %arg5[%c0_8, %c0_9] : memref<32x32xf32, #tpu.memory_space<vmem>>, vector<32x32xf32>
    %cst_10 = arith.constant dense<0.000000e+00> : vector<8x32xf32>
    %16 = tpu.matmul %14, %15, %cst_10 {dimension_numbers = #tpu.dot_dimension_numbers<[1], [0], [0], [1], [0, 0, 1, 1], [], []>} : vector<8x32xf32>, vector<32x32xf32>, vector<8x32xf32> -> vector<8x32xf32>
    %c0_11 = arith.constant 0 : index
    %c0_12 = arith.constant 0 : index
    %17 = vector.load %arg6[%c0_11, %c0_12] : memref<1x32xf32, #tpu.memory_space<vmem>>, vector<1x32xf32>
    %18 = vector.broadcast %17 : vector<1x32xf32> to vector<8x32xf32>
    %19 = arith.addf %16, %18 : vector<8x32xf32>
    %cst_13 = arith.constant 0.000000e+00 : f32
    %20 = vector.broadcast %cst_13 : f32 to vector<8x32xf32>
    %21 = arith.maximumf %19, %20 : vector<8x32xf32>
    %c0_14 = arith.constant 0 : index
    %c0_15 = arith.constant 0 : index
    %22 = vector.load %arg7[%c0_14, %c0_15] : memref<32x4xf32, #tpu.memory_space<vmem>>, vector<32x4xf32>
    %cst_16 = arith.constant dense<0.000000e+00> : vector<8x4xf32>
    %23 = tpu.matmul %21, %22, %cst_16 {dimension_numbers = #tpu.dot_dimension_numbers<[1], [0], [0], [1], [0, 0, 1, 1], [], []>} : vector<8x32xf32>, vector<32x4xf32>, vector<8x4xf32> -> vector<8x4xf32>
    %c0_17 = arith.constant 0 : index
    %c0_18 = arith.constant 0 : index
    %24 = vector.load %arg8[%c0_17, %c0_18] : memref<1x4xf32, #tpu.memory_space<vmem>>, vector<1x4xf32>
    %25 = vector.broadcast %24 : vector<1x4xf32> to vector<8x4xf32>
    %26 = arith.addf %23, %25 : vector<8x4xf32>
    %c0_19 = arith.constant 0 : index
    %c0_20 = arith.constant 0 : index
    %27 = vector.load %arg9[%c0_19, %c0_20] : memref<8x4xf32, #tpu.memory_space<vmem>>, vector<8x4xf32>
    tpu.vector_store %arg9[%c0_19, %c0_20], %26 {strides = array<i32>} : memref<8x4xf32, #tpu.memory_space<vmem>>, vector<8x4xf32>,
    return
  }
  func.func @transform_0(%arg0: i32) -> (i32, i32) {
    %c0_i32 = arith.constant 0 : i32
    %c0_i32_0 = arith.constant 0 : i32
    return %arg0, %c0_i32 : i32, i32
  }
  func.func @transform_1(%arg0: i32) -> (i32, i32) {
    %c0_i32 = arith.constant 0 : i32
    %c0_i32_0 = arith.constant 0 : i32
    %c0_i32_1 = arith.constant 0 : i32
    return %c0_i32, %c0_i32_0 : i32, i32
  }
  func.func @transform_2(%arg0: i32) -> (i32, i32) {
    %c0_i32 = arith.constant 0 : i32
    %c0_i32_0 = arith.constant 0 : i32
    %c0_i32_1 = arith.constant 0 : i32
    return %c0_i32, %c0_i32_0 : i32, i32
  }
  func.func @transform_3(%arg0: i32) -> (i32, i32) {
    %c0_i32 = arith.constant 0 : i32
    %c0_i32_0 = arith.constant 0 : i32
    %c0_i32_1 = arith.constant 0 : i32
    return %c0_i32, %c0_i32_0 : i32, i32
  }
  func.func @transform_4(%arg0: i32) -> (i32, i32) {
    %c0_i32 = arith.constant 0 : i32
    %c0_i32_0 = arith.constant 0 : i32
    %c0_i32_1 = arith.constant 0 : i32
    return %c0_i32, %c0_i32_0 : i32, i32
  }
  func.func @transform_5(%arg0: i32) -> (i32, i32) {
    %c0_i32 = arith.constant 0 : i32
    %c0_i32_0 = arith.constant 0 : i32
    %c0_i32_1 = arith.constant 0 : i32
    return %c0_i32, %c0_i32_0 : i32, i32
  }
  func.func @transform_6(%arg0: i32) -> (i32, i32) {
    %c0_i32 = arith.constant 0 : i32
    %c0_i32_0 = arith.constant 0 : i32
    %c0_i32_1 = arith.constant 0 : i32
    return %c0_i32, %c0_i32_0 : i32, i32
  }
  func.func @transform_7(%arg0: i32) -> (i32, i32) {
    %c0_i32 = arith.constant 0 : i32
    %c0_i32_0 = arith.constant 0 : i32
    %c0_i32_1 = arith.constant 0 : i32
    return %c0_i32, %c0_i32_0 : i32, i32
  }
  func.func @transform_8(%arg0: i32) -> (i32, i32) {
    %c0_i32 = arith.constant 0 : i32
    %c0_i32_0 = arith.constant 0 : i32
    return %arg0, %c0_i32 : i32, i32
  }
}

</mosaic_0001>

<bundles_post_ra>
// kernel: urbf_forward.1
= control target key start
LH: loop header
LB: loop body
LE: loop exit
PB: predicated region body
PF: predicated region fallthrough
CT: control target
= control target key end

     0   :  { %v358_v0 = vmov 0.0   ;;  %vm359_vm0 = vmmov 0   ;;  %vm31_vm1 = vcmask 130048   ;;  %vm140_vm2 = vcmask 261120   ;;  %s455_s1 = inlined_call_operand.vmem [shape: f32[16,32], index: 1, kind: input, shape index: {}]   ;;  %s456_s0 = inlined_call_operand.vmem [shape: f32[8,16], index: 0, kind: input, shape index: {}]   ;;  %s457_s4 = inlined_call_operand.vmem [shape: f32[32,32], index: 4, kind: input, shape index: {}]   ;;  %s458_s6 = inlined_call_operand.vmem [shape: f32[32,4], index: 6, kind: input, shape index: {}]   ;;  %s459_s2 = inlined_call_operand.vmem [shape: f32[1,32], index: 2, kind: input, shape index: {}]   ;;  %s460_s3 = inlined_call_operand.vmem [shape: f32[1,32], index: 3, kind: input, shape index: {}]   ;;  %s461_s5 = inlined_call_operand.vmem [shape: f32[1,32], index: 5, kind: input, shape index: {}]   ;;  %s462_s7 = inlined_call_operand.vmem [shape: f32[1,4], index: 7, kind: input, shape index: {}]   ;;  %s463_s8 = inlined_call_operand.vmem [shape: f32[8,4], index: 8, kind: output, shape index: {}]  }
   0x1   :  { %325 = vmatprep.subr.mxu0 %v358_v0  ;;  %v36_v1 = vld [vmem:[%s455_s1 + $0x8] sm:$0xff]  ;;  %v35_v2 = vld [vmem:[%s455_s1] sm:$0xff]  ;;  %329 = vmatprep.mubr.msk.f32.mxu0 %vm359_vm0, %v358_v0  ;;  %v132_v6 = vld [vmem:[%s457_s4 + $0x18] sm:$0xff]  ;;  %vm299_vm3 = vcmask 31744  }
   0x2   :  { %v29_v3 = vld [vmem:[%s456_s0] sm:$0xff]  ;;  %326 = vmatpush3.msra.mxu0 %v36_v1  ;;  %332 = vmatprep.subr.mxu1 %v358_v0  ;;  %v131_v7 = vld [vmem:[%s457_s4 + $0x10] sm:$0xff]  ;;  %v130_v8 = vld [vmem:[%s457_s4 + $0x8] sm:$0xff] }
   0x3   :  { %v30_v4 = vmul.f32 %v29_v3, %v29_v3  ;;  %327 = vmatprep.subr.mxu0 %v358_v0  ;;  %340 = vmatprep.mubr.msk.f32.mxu1 %vm359_vm0, %v358_v0  ;;  %v129_v9 = vld [vmem:[%s457_s4] sm:$0xff]  ;;  %v218_v10 = vld [vmem:[%s458_s6 + $0x18] sm:$0xff]  ;;  %v217_v21 = vld [vmem:[%s458_s6 + $0x10] sm:$0xff] }
   0x4   :  { %328 = vmatpush3.msra.mxu0 %v35_v2  ;;  %333 = vmatpush3.msra.mxu1 %v132_v6  ;;  %v306_v12 = vld [vmem:[%s459_s2] ss:$0 sm:$0xff]  ;;  %v216_v22 = vld [vmem:[%s458_s6 + $0x8] sm:$0xff] }
   0x5   :  { %v32_v5 = vsel %vm31_vm1, %v30_v4, 0.0  ;;  %330 = vmatmul.mubr.msk.f32.vlgmr.msra.gmra.mxu0 %vm31_vm1, %v29_v3  ;;  %343 = vmatprep.subr.mxu0 %v358_v0  ;;  %v307_v15 = vld [vmem:[%s460_s3] ss:$0 sm:$0xff] }
   0x6   :  { %33 = vadd.xlane.f32.xlu0 %v32_v5  ;;  %351 = vmatprep.mubr.msk.f32.mxu0 %vm359_vm0, %v358_v0  ;;  %v215_v23 = vld [vmem:[%s458_s6] sm:$0xff] }
   0x7   :  { %334 = vmatprep.subr.mxu1 %v358_v0  ;;  %344 = vmatpush3.msra.mxu0 %v218_v10  ;;  %v308_v24 = vld [vmem:[%s461_s5] ss:$0 sm:$0xff] }
   0x8   :  { %335 = vmatpush3.msra.mxu1 %v131_v7  ;;  %345 = vmatprep.subr.mxu0 %v358_v0  ;;  %v310_v29 = vld [vmem:[%s462_s7] ss:$0 sm:$0xff] }
   0x9   :  { %336 = vmatprep.subr.mxu1 %v358_v0  ;;  %346 = vmatpush3.msra.mxu0 %v217_v21 }
   0xa   :  { %337 = vmatpush3.msra.mxu1 %v130_v8  ;;  %347 = vmatprep.subr.mxu0 %v358_v0 }
   0xb   :  { %338 = vmatprep.subr.mxu1 %v358_v0  ;;  %348 = vmatpush3.msra.mxu0 %v216_v22 }
   0xc   :  { %339 = vmatpush3.msra.mxu1 %v129_v9  ;;  %349 = vmatprep.subr.mxu0 %v358_v0 }
   0xd   :  { %350 = vmatpush3.msra.mxu0 %v215_v23 }
  0x8f   :  { %v34_v11 = vpop.xlane.xlu0 %33 }
  0x90   :  { %v117_v13 = vmul.f32 %v306_v12, %v34_v11 }
  0xc5   :  { %v106_v14 = vpop.f32.mrf.mxu0 }
  0xc6   :  { %v118_v16 = vsub.f32 %v106_v14, %v117_v13 }
  0xc7   :  { %v331_v17 = vpop.f32.mrf.mxu0 }
  0xc8   :  { %v126_v18 = vadd.f32 %v307_v15, %v118_v16 }
  0xca   :  { %v127_v19 = vmul.f32 1.442695, %v126_v18 }
  0xcc   :  { %356 = vpow2.f32 %v127_v19 }
  0xd9   :  { %v357_v20 = vpop.eup %356 }
  0xda   :  { %341 = vmatmul.mubr.msk.f32.vlgmr.msra.gmra.mxu1 %vm140_vm2, %v357_v20 }
 0x19a   :  { %v210_v25 = vpop.f32.mrf.mxu1 }
 0x19b   :  { %v211_v26 = vadd.f32 %v308_v24, %v210_v25 }
 0x19c   :  { %v342_v27 = vpop.f32.mrf.mxu1 }
 0x19d   :  { %v214_v28 = vmax.f32 %v211_v26, 0.0 }
 0x19f   :  { %352 = vmatmul.mubr.msk.f32.vlgmr.msra.gmra.mxu0 %vm140_vm2, %v214_v28 }
 0x25f   :  { %v295_v30 = vpop.f32.mrf.mxu0 }
 0x260   :  { %v296_v31 = vadd.f32 %v310_v29, %v295_v30 }
 0x261   :  { %v353_v32 = vpop.f32.mrf.mxu0 }
 0x262   :  { %300 = vst.msk [vmem:[%s463_s8] sm:$0xff] %vm299_vm3, %v296_v31 }

</bundles_post_ra>
